<compile_context>
chip_gen: v7x
topology: tpu7x:2x2x1
jax: 0.10.0
libtpu: 0.0.40
codegen_flags: <defaults>
</compile_context>

<pallas_src>
import numpy as np
import jax
import jax.numpy as jnp
from jax.experimental import pallas as pl
from jax.experimental.pallas import tpu as pltpu


# ----------------------------------------------------------------------------
# Glue: build free_weight / free_bias masks exactly like the PyTorch module
# ----------------------------------------------------------------------------
def separate_weights_mask(in_features, out_features, separate_inputs, separate_outputs):
    free = np.zeros((out_features, in_features), dtype=bool)
    in_idx = np.cumsum(separate_inputs) - separate_inputs
    out_idx = np.cumsum(separate_outputs) - separate_outputs
    for isz, osz, ii, oi in zip(separate_inputs, separate_outputs, in_idx, out_idx):
        free[oi:oi + osz, ii:ii + isz] = True
    return free


def build_masks(in_features, out_features, separate_inputs=None, separate_outputs=None,
                zero_inputs=None, zero_outputs=None):
    if zero_outputs is None:
        zero_outputs = np.zeros(out_features, dtype=np.int32)
    if zero_inputs is None:
        zero_inputs = np.zeros(in_features, dtype=np.int32)
    if separate_inputs is not None:
        assert separate_inputs.sum() == in_features
        if separate_outputs is None:
            q, r = divmod(out_features, separate_inputs.shape[0])
            separate_outputs = np.array([q + 1] * r + [q] * (separate_inputs.shape[0] - r))
        assert separate_outputs.sum() == out_features
        free_weight = separate_weights_mask(in_features, out_features,
                                            separate_inputs, separate_outputs)
    else:
        free_weight = np.full((out_features, in_features), True)
    free_weight[zero_outputs.astype(bool)] = False
    free_weight[:, zero_inputs.astype(bool)] = False
    free_bias = (1 - zero_outputs).astype(bool)
    return free_weight, free_bias


def scatter_flat(flat_vals, mask):
    """Place flat_vals into zeros at True positions of mask, row-major (PyTorch semantics)."""
    mask = np.asarray(mask)
    idx = np.flatnonzero(mask)
    dense = jnp.zeros(mask.size, dtype=flat_vals.dtype).at[idx].set(flat_vals)
    return dense.reshape(mask.shape)


# ----------------------------------------------------------------------------
# Helpers
# ----------------------------------------------------------------------------
def _round_up(x, m):
    return (x + m - 1) // m * m


def _pick_tile(dim, preferred):
    """Largest 128-multiple <= preferred that divides dim (dim is a 128-multiple)."""
    pref = max(128, (preferred // 128) * 128)
    t = min(pref, dim)
    while dim % t:
        t -= 128
    return t


def _divisor_tiles(dim):
    """Descending 128-multiples dividing dim (dim is a 128-multiple)."""
    return [t for t in range(dim, 0, -128) if dim % t == 0]


_MASKED_NEG = -1.0e4   # softplus(-1e4) == 0.0 exactly in f32


# ----------------------------------------------------------------------------
# Kernel 1 (one-shot prologue): W_t = softplus(masked_raw_t), cast to MXU dtype.
# Mask already folded into masked_raw_t (masked/padded entries == -1e4 -> weight 0).
# ----------------------------------------------------------------------------
def weight_prep_kernel(raw_ref, w_ref):
    r = raw_ref[...]                                            # (tk, tn) f32
    # numerically-stable softplus == logaddexp(r, 0)
    w = jnp.maximum(r, 0.0) + jnp.log1p(jnp.exp(-jnp.abs(r)))
    w_ref[...] = w.astype(w_ref.dtype)


def prep_weight(raw_weight_dense, free_weight_mask, *, softplus=True,
                out_dtype=jnp.float32, in_pad, out_pad):
    """Padded, transposed (in_pad, out_pad), masked, softplus'd weight in `out_dtype`."""
    out_f, in_f = raw_weight_dense.shape
    neg = _MASKED_NEG if softplus else 0.0
    # Fold the mask into the raw values (one-shot XLA pass over a small weight).
    masked = jnp.where(free_weight_mask, raw_weight_dense.astype(jnp.float32), neg)
    raw_t = jnp.full((in_pad, out_pad), neg, jnp.float32).at[:in_f, :out_f].set(masked.T)

    if not softplus:                       # plain linear: weight == masked raw
        return raw_t.astype(out_dtype)

    tk = _pick_tile(in_pad, 512)
    tn = _pick_tile(out_pad, 512)
    iw = jnp.dtype(out_dtype).itemsize
    return pl.pallas_call(
        weight_prep_kernel,
        out_shape=jax.ShapeDtypeStruct((in_pad, out_pad), out_dtype),
        grid_spec=pltpu.PrefetchScalarGridSpec(
            num_scalar_prefetch=0,
            grid=(in_pad // tk, out_pad // tn),
            in_specs=[pl.BlockSpec((tk, tn), lambda i, j: (i, j))],
            out_specs=pl.BlockSpec((tk, tn), lambda i, j: (i, j)),
        ),
        compiler_params=pltpu.CompilerParams(
            dimension_semantics=("parallel", "parallel")),
        cost_estimate=pl.CostEstimate(
            flops=4 * in_pad * out_pad,
            transcendentals=2 * in_pad * out_pad,
            bytes_accessed=(4 + iw) * in_pad * out_pad),
    )(raw_t)


# ----------------------------------------------------------------------------
# Kernel 2a (hot path, weight-resident): out = x @ W + bias, no K grid axis.
# ----------------------------------------------------------------------------
def linear_resident_kernel(x_ref, w_ref, b_ref, o_ref):
    # x cast to MXU dtype on the VPU (hidden under the MXU); f32 accumulation.
    o_ref[...] = (jnp.dot(x_ref[...].astype(w_ref.dtype), w_ref[...],
                          preferred_element_type=jnp.float32)
                  + b_ref[...]).astype(o_ref.dtype)


# ----------------------------------------------------------------------------
# Kernel 2b (hot path, K-tiled): accumulate directly into the f32 output block.
# ----------------------------------------------------------------------------
def linear_ktiled_kernel(x_ref, w_ref, b_ref, o_ref):
    @pl.when(pl.program_id(2) == 0)
    def _():
        o_ref[...] = jnp.broadcast_to(b_ref[...], o_ref.shape)   # init with bias
    o_ref[...] += jnp.dot(x_ref[...].astype(w_ref.dtype), w_ref[...],
                          preferred_element_type=jnp.float32)


# ----------------------------------------------------------------------------
# Wrapper: full SoftplusLinear forward
# ----------------------------------------------------------------------------
def softplus_linear(x, raw_weight_dense, free_weight_mask, bias_dense, *,
                    softplus=True, mxu_dtype=jnp.float32,
                    tb=None, tn=None, tk=None,
                    vmem_budget_bytes=40 << 20,
                    weight_resident_max_bytes=16 << 20):
    """x: (B, in_features).  Returns (B, out_features) f32."""
    B, in_f = x.shape
    out_f = raw_weight_dense.shape[0]
    xw = jnp.dtype(x.dtype).itemsize
    iw = jnp.dtype(mxu_dtype).itemsize

    in_p = _round_up(in_f, 128)
    out_p = _round_up(out_f, 128)

    # ---- batch tile: large (512-preferred), sublane-packing-granular, and split in
    # two when it would otherwise be a single block (feeds both v7x TensorCores).
    gran = 8 if xw >= 4 else (16 if xw == 2 else 32)
    tb_pref = 512 if tb is None else tb
    tb_sel = min(tb_pref, _round_up(B, 128))
    tb_sel = max(gran, _round_up(tb_sel, gran))
    if tb is None and _round_up(B, 128) >= 256 and _round_up(B, tb_sel) // tb_sel < 2:
        tb_sel = max(128, _round_up(_round_up(B, 128) // 2, 16))
    B_p = _round_up(B, tb_sel)

    # ---- one-shot weight prologue (softplus + mask folded in, pre-transposed, padded).
    w_t = prep_weight(raw_weight_dense, free_weight_mask, softplus=softplus,
                      out_dtype=mxu_dtype, in_pad=in_p, out_pad=out_p)
    bias_p = jnp.zeros((1, out_p), jnp.float32).at[0, :out_f].set(
        bias_dense.astype(jnp.float32))

    # ---- activations: keep original dtype (cast in-kernel); pad only when needed.
    if B_p == B and in_p == in_f:
        x_in = x
    else:
        x_in = jnp.zeros((B_p, in_p), x.dtype).at[:B, :in_f].set(x)

    headroom = 8 << 20
    weight_bytes = in_p * out_p * iw

    # ------------------------------------------------------------------
    # Path 1: whole-K, weight-resident.  W streamed from HBM exactly once
    # (out-block-major grid); no reduction axis, no accumulator, no pl.when.
    # ------------------------------------------------------------------
    if tk is None and weight_bytes <= weight_resident_max_bytes:
        tn_sel = None
        footprint = 0
        for tn_try in _divisor_tiles(out_p):
            if tn is not None and tn_try > max(128, tn):
                continue
            fp = (2 * tb_sel * in_p * xw          # x blocks (double-buffered)
                  + 2 * in_p * tn_try * iw        # weight blocks
                  + 2 * tb_sel * tn_try * 4       # output blocks (f32)
                  + 2 * 8 * tn_try * 4)           # bias block
            if fp <= vmem_budget_bytes:
                tn_sel, footprint = tn_try, fp
                break
        if tn_sel is not None:
            out_padded = pl.pallas_call(
                linear_resident_kernel,
                out_shape=jax.ShapeDtypeStruct((B_p, out_p), jnp.float32),
                grid_spec=pltpu.PrefetchScalarGridSpec(
                    num_scalar_prefetch=0,
                    grid=(out_p // tn_sel, B_p // tb_sel),      # weight-major order
                    in_specs=[
                        pl.BlockSpec((tb_sel, in_p), lambda j, i: (i, 0)),   # x
                        pl.BlockSpec((in_p, tn_sel), lambda j, i: (0, j)),   # W (pre-transposed)
                        pl.BlockSpec((1, tn_sel), lambda j, i: (0, j)),      # bias
                    ],
                    out_specs=pl.BlockSpec((tb_sel, tn_sel), lambda j, i: (i, j)),
                ),
                compiler_params=pltpu.CompilerParams(
                    dimension_semantics=("parallel", "parallel"),
                    vmem_limit_bytes=int(min(48 << 20, max(footprint + headroom, 24 << 20)))),
                cost_estimate=pl.CostEstimate(
                    flops=2 * B_p * in_p * out_p, transcendentals=0,
                    bytes_accessed=(B_p * in_p * xw * (out_p // tn_sel)
                                    + in_p * out_p * iw + out_p * 4 + B_p * out_p * 4)),
            )(x_in, w_t, bias_p)
            return out_padded[:B, :out_f]

    # ------------------------------------------------------------------
    # Path 2: K-tiled reduction (reduction axis last, "arbitrary"); accumulate
    # directly into the resident f32 output block, initialized with the bias.
    # ------------------------------------------------------------------
    tn_sel = _pick_tile(out_p, 512 if tn is None else tn)
    tk_sel = _pick_tile(in_p, 512 if tk is None else tk)
    footprint = (2 * tb_sel * tk_sel * xw + 2 * tk_sel * tn_sel * iw
                 + 2 * tb_sel * tn_sel * 4 + 2 * 8 * tn_sel * 4)
    out_padded = pl.pallas_call(
        linear_ktiled_kernel,
        out_shape=jax.ShapeDtypeStruct((B_p, out_p), jnp.float32),
        grid_spec=pltpu.PrefetchScalarGridSpec(
            num_scalar_prefetch=0,
            grid=(B_p // tb_sel, out_p // tn_sel, in_p // tk_sel),
            in_specs=[
                pl.BlockSpec((tb_sel, tk_sel), lambda i, j, k: (i, k)),   # x
                pl.BlockSpec((tk_sel, tn_sel), lambda i, j, k: (k, j)),   # W (pre-transposed)
                pl.BlockSpec((1, tn_sel), lambda i, j, k: (0, j)),        # bias
            ],
            out_specs=pl.BlockSpec((tb_sel, tn_sel), lambda i, j, k: (i, j)),
        ),
        compiler_params=pltpu.CompilerParams(
            dimension_semantics=("parallel", "parallel", "arbitrary"),
            vmem_limit_bytes=int(min(48 << 20, max(footprint + headroom, 24 << 20)))),
        cost_estimate=pl.CostEstimate(
            flops=2 * B_p * in_p * out_p, transcendentals=0,
            bytes_accessed=(B_p * in_p * xw * (out_p // tn_sel)
                            + in_p * out_p * iw * (B_p // tb_sel)
                            + out_p * 4 + B_p * out_p * 4)),
    )(x_in, w_t, bias_p)
    return out_padded[:B, :out_f]


# ----------------------------------------------------------------------------
# Plain-JAX reference for correctness checks
# ----------------------------------------------------------------------------
def reference(x, raw_weight_dense, free_weight_mask, bias_dense, softplus=True):
    w = jnp.logaddexp(raw_weight_dense, 0.0) if softplus else raw_weight_dense
    w = w * free_weight_mask.astype(jnp.float32)
    return (jnp.dot(x.astype(jnp.float32), w.T, precision=jax.lax.Precision.HIGHEST)
            + bias_dense[None, :])


if __name__ == "__main__":
    key = jax.random.PRNGKey(0)

    def make_case(key, in_features, out_features, batch, **mask_kw):
        free_weight, free_bias = build_masks(in_features, out_features, **mask_kw)
        k_x, k_w, k_b = jax.random.split(key, 3)
        raw_weight_param = jax.random.normal(k_w, (int(free_weight.sum()),), jnp.float32)
        bias_param = jax.random.normal(k_b, (int(free_bias.sum()),), jnp.float32)
        raw_weight_dense = scatter_flat(raw_weight_param, free_weight)   # (out, in)
        bias_dense = scatter_flat(bias_param, free_bias)                 # (out,)
        x = jax.random.normal(k_x, (batch, in_features), jnp.float32)
        return x, raw_weight_dense, jnp.asarray(free_weight), bias_dense

    # ---- case 1: small grouped/zeroed config (weight-resident fast path) ----
    in_f, out_f, B = 32, 16, 10
    zero_in = np.zeros(in_f, np.int32); zero_in[3] = 1
    zero_out = np.zeros(out_f, np.int32); zero_out[0] = 1; zero_out[7] = 1
    x1, raw1, mask1, bias1 = make_case(key, in_f, out_f, B,
                                       separate_inputs=np.array([16, 16]),
                                       zero_inputs=zero_in, zero_outputs=zero_out)
    ref1 = reference(x1, raw1, mask1, bias1)

    # tight check of the one-shot weight prologue (f32)
    in_p, out_p = _round_up(in_f, 128), _round_up(out_f, 128)
    w_t = jax.block_until_ready(
        prep_weight(raw1, mask1, softplus=True, out_dtype=jnp.float32,
                    in_pad=in_p, out_pad=out_p))
    w_ref = jnp.zeros((in_p, out_p), jnp.float32).at[:in_f, :out_f].set(
        (jnp.logaddexp(raw1, 0.0) * mask1.astype(jnp.float32)).T)
    np.testing.assert_allclose(np.asarray(w_t), np.asarray(w_ref), rtol=1e-5, atol=1e-6)

    # full forward, f32 MXU (PyTorch-parity default)
    out_f32 = jax.block_until_ready(softplus_linear(x1, raw1, mask1, bias1))
    np.testing.assert_allclose(np.asarray(out_f32), np.asarray(ref1), rtol=1e-2, atol=1e-2)

    # full forward, bf16 MXU opt-in fast path (v6e/v7x)
    out_bf16 = jax.block_until_ready(
        softplus_linear(x1, raw1, mask1, bias1, mxu_dtype=jnp.bfloat16))
    np.testing.assert_allclose(np.asarray(out_bf16), np.asarray(ref1), rtol=5e-2, atol=5e-2)

    # softplus=False (plain masked linear)
    ref1_nosp = reference(x1, raw1, mask1, bias1, softplus=False)
    out_nosp = jax.block_until_ready(
        softplus_linear(x1, raw1, mask1, bias1, softplus=False))
    np.testing.assert_allclose(np.asarray(out_nosp), np.asarray(ref1_nosp), rtol=1e-2, atol=1e-2)

    # ---- case 2: force the K-tiled accumulation path (tk given => 2 K-steps) ----
    in_f2, out_f2, B2 = 200, 48, 37
    zero_out2 = np.zeros(out_f2, np.int32); zero_out2[5] = 1
    x2, raw2, mask2, bias2 = make_case(jax.random.fold_in(key, 1), in_f2, out_f2, B2,
                                       zero_outputs=zero_out2)
    ref2 = reference(x2, raw2, mask2, bias2)
    out2 = jax.block_until_ready(
        softplus_linear(x2, raw2, mask2, bias2, tk=128, tn=128))
    np.testing.assert_allclose(np.asarray(out2), np.asarray(ref2), rtol=1e-2, atol=1e-2)

    print("KERNEL_OK")
</pallas_src>

<mosaic_0001>
module attributes {stable_mosaic.version = 11 : i64} {
  func.func @weight_prep_kernel(%arg0: i32, %arg1: i32, %arg2: memref<128x128xf32, #tpu.memory_space<vmem>>, %arg3: memref<128x128xf32, #tpu.memory_space<vmem>>) attributes {dimension_semantics = [#tpu.dimension_semantics<parallel>, #tpu.dimension_semantics<parallel>], iteration_bounds = array<i64: 1, 1>, scalar_prefetch = 0 : i64, scratch_operands = 0 : i64, tpu.core_type = #tpu.core_type<tc>, window_params = [{transform_indices = @transform_0, window_bounds = array<i64: 128, 128>}, {transform_indices = @transform_1, window_bounds = array<i64: 128, 128>}]} {
    %c0 = arith.constant 0 : index
    %c0_0 = arith.constant 0 : index
    %0 = vector.load %arg2[%c0, %c0_0] : memref<128x128xf32, #tpu.memory_space<vmem>>, vector<128x128xf32>
    %cst = arith.constant 0.000000e+00 : f32
    %1 = vector.broadcast %cst : f32 to vector<128x128xf32>
    %2 = arith.maximumf %0, %1 : vector<128x128xf32>
    %3 = math.absf %0 : vector<128x128xf32>
    %cst_1 = arith.constant 0.000000e+00 : f32
    %4 = vector.broadcast %cst_1 : f32 to vector<128x128xf32>
    %5 = arith.subf %4, %3 : vector<128x128xf32>
    %6 = math.exp %5 : vector<128x128xf32>
    %7 = math.log1p %6 : vector<128x128xf32>
    %8 = arith.addf %2, %7 : vector<128x128xf32>
    %c0_2 = arith.constant 0 : index
    %c0_3 = arith.constant 0 : index
    %9 = vector.load %arg3[%c0_2, %c0_3] : memref<128x128xf32, #tpu.memory_space<vmem>>, vector<128x128xf32>
    tpu.vector_store %arg3[%c0_2, %c0_3], %8 {strides = array<i32>} : memref<128x128xf32, #tpu.memory_space<vmem>>, vector<128x128xf32>,
    return
  }
  func.func @transform_0(%arg0: i32, %arg1: i32) -> (i32, i32) {
    %c0_i32 = arith.constant 0 : i32
    return %arg0, %arg1 : i32, i32
  }
  func.func @transform_1(%arg0: i32, %arg1: i32) -> (i32, i32) {
    %c0_i32 = arith.constant 0 : i32
    return %arg0, %arg1 : i32, i32
  }
}

</mosaic_0001>

<bundles_post_ra>
// kernel: tpu_custom_call.1
= control target key start
LH: loop header
LB: loop body
LE: loop exit
PB: predicated region body
PF: predicated region fallthrough
CT: control target
= control target key end

     0   :  { %6 = vsyncpa [#allocation3], 0  ;;  %s651_s0 = inlined_call_operand.hbm [shape: f32[128,128], index: 0, kind: input, shape index: {}]   ;;  %s652_s1 = inlined_call_operand.hbm [shape: f32[128,128], index: 1, kind: output, shape index: {}]  }
   0x1   :  { %7 = vsyncpa [#allocation4], 0  ;;  %s428_s6 = smov [#allocation2]   ;;  %s380_s10 = scalar_lea.hbm %s651_s0, 2048 }
   0x2   :  { %s13_s7 = sshll.u32 %s428_s6, 4  ;;  %p381_p0 = scmp.ne.s32.totalorder %s651_s0, %s380_s10  ;;  %s14_s7 = int_to_ptr.vmem [resolvable:$true] %s13_s7 }
   0x3   :  { %p384_p1 = scmp.lt.u32.totalorder %s380_s10, %s651_s0 }
   0x5   :  { %p386_p2 = pnand %p384_p1, %p381_p0 }
   0x7   :  { %389 = shalt.err (!%p386_p2)
}
   0x8   :  { %s390_s15 = scalar_lea.vmem %s14_s7, 2048  ;;  %p395_p4 = scmp.lt.s32.totalorder %s14_s7, %s14_s7 }
   0x9   :  { %p391_p3 = scmp.ne.s32.totalorder %s14_s7, %s390_s15  ;;  %p396_p5 = scmp.lt.s32.totalorder %s390_s15, %s390_s15 }
   0xb   :  { %p397_p6 = por %p396_p5, %p395_p4 }
   0xd   :  { %p398_p7 = pnand %p397_p6, %p391_p3 }
   0xf   :  { %401 = shalt.err (!%p398_p7)
}
  0x10   :  { %s429_s16 = smov 128   ;;  %s430_s17 = smov 8  }
  0x11   :  { %19 = dma.hbm_to_vmem [thread:$0]  %s651_s0, 2048, %s14_s7, [#allocation3], %s429_s16, %s429_s16, %s430_s17  }
  0x12   :  { %424 = dma.done.wait [#allocation3], 2048  }
  0x13   :  { %425 = vsyncadd [#allocation3], 4294965248  ;;  %v457_v0 = vld [vmem:[#allocation2] sm:$0xff]  ;;  %v459_v1 = vld [vmem:[#allocation2 + $0x8] sm:$0xff]  ;;  %s431_s0 = smov [#allocation5]  }
  0x14   :  { %v461_v2 = vld [vmem:[#allocation2 + $0x10] sm:$0xff]  ;;  %v55_v3 = vand.u32 2147483647, %v457_v0  ;;  %v56_v4 = vand.u32 2147483647, %v459_v1  ;;  %v466_v6 = vld [vmem:[#allocation2 + $0x18] sm:$0xff] }
  0x15   :  { %v57_v5 = vand.u32 2147483647, %v461_v2  ;;  %v468_v7 = vld [vmem:[#allocation2 + $0x20] sm:$0xff]  ;;  %v58_v10 = vand.u32 2147483647, %v466_v6  ;;  %v471_v11 = vld [vmem:[#allocation2 + $0x28] sm:$0xff] }
  0x16   :  { %v71_v8 = vsub.f32 0.0, %v55_v3  ;;  %v72_v9 = vsub.f32 0.0, %v56_v4  ;;  %v59_v13 = vand.u32 2147483647, %v468_v7  ;;  %v474_v14 = vld [vmem:[#allocation2 + $0x30] sm:$0xff]  ;;  %v476_v15 = vld [vmem:[#allocation2 + $0x38] sm:$0xff] }
  0x17   :  { %v73_v12 = vsub.f32 0.0, %v57_v5  ;;  %v74_v18 = vsub.f32 0.0, %v58_v10  ;;  %v60_v21 = vand.u32 2147483647, %v471_v11  ;;  %v61_v23 = vand.u32 2147483647, %v474_v14 }
  0x18   :  { %v87_v16 = vmul.f32 1.442695, %v71_v8  ;;  %v89_v17 = vmul.f32 1.442695, %v72_v9  ;;  %v75_v20 = vsub.f32 0.0, %v59_v13  ;;  %v481_v27 = vld [vmem:[#allocation2 + $0x40] sm:$0xff] }
  0x19   :  { %v91_v19 = vmul.f32 1.442695, %v73_v12  ;;  %v93_v22 = vmul.f32 1.442695, %v74_v18  ;;  %v62_v24 = vand.u32 2147483647, %v476_v15 }
  0x1a   :  { %316 = vpow2.f32 %v87_v16  ;;  %v95_v25 = vmul.f32 1.442695, %v75_v20  ;;  %v76_v26 = vsub.f32 0.0, %v60_v21  ;;  %v483_v28 = vld [vmem:[#allocation2 + $0x48] sm:$0xff]  ;;  %v77_v29 = vsub.f32 0.0, %v61_v23  ;;  %v485_v31 = vld [vmem:[#allocation2 + $0x50] sm:$0xff] }
  0x1b   :  { %318 = vpow2.f32 %v89_v17  ;;  %v78_v30 = vsub.f32 0.0, %v62_v24  ;;  %v63_v33 = vand.u32 2147483647, %v481_v27  ;;  %v488_v34 = vld [vmem:[#allocation2 + $0x58] sm:$0xff]  ;;  %v64_v36 = vand.u32 2147483647, %v483_v28 }
  0x1c   :  { %320 = vpow2.f32 %v91_v19  ;;  %v97_v32 = vmul.f32 1.442695, %v76_v26  ;;  %v99_v35 = vmul.f32 1.442695, %v77_v29  ;;  %v65_v39 = vand.u32 2147483647, %v485_v31 }
  0x1d   :  { %322 = vpow2.f32 %v93_v22  ;;  %v101_v37 = vmul.f32 1.442695, %v78_v30  ;;  %v79_v38 = vsub.f32 0.0, %v63_v33  ;;  %v80_v40 = vsub.f32 0.0, %v64_v36  ;;  %v494_v45 = vld [vmem:[#allocation2 + $0x60] sm:$0xff]  ;;  %v503_v57 = vld [vmem:[#allocation2 + $0x68] sm:$0xff] }
  0x1e   :  { %324 = vpow2.f32 %v95_v25  ;;  %v66_v41 = vand.u32 2147483647, %v488_v34  ;;  %v39_v42 = vmax.f32 %v457_v0, 0.0  ;;  %v81_v44 = vsub.f32 0.0, %v65_v39  ;;  %v506_v5 = vld [vmem:[#allocation2 + $0x70] sm:$0xff]  ;;  %s300_s20 = sshll.u32 %s431_s0, 4  ;;  %s301_s20 = int_to_ptr.vmem [resolvable:$true] %s300_s20 }
  0x1f   :  { %326 = vpow2.f32 %v97_v32  ;;  %v103_v43 = vmul.f32 1.442695, %v79_v38  ;;  %v40_v46 = vmax.f32 %v459_v1, 0.0  ;;  %v41_v47 = vmax.f32 %v461_v2, 0.0  ;;  %s402_s21 = scalar_lea.vmem %s301_s20, 2048  ;;  %p407_p9 = scmp.lt.s32.totalorder %s301_s20, %s301_s20 }
  0x20   :  { %328 = vpow2.f32 %v99_v35  ;;  %v105_v48 = vmul.f32 1.442695, %v80_v40  ;;  %v82_v49 = vsub.f32 0.0, %v66_v41  ;;  %v42_v50 = vmax.f32 %v466_v6, 0.0  ;;  %p403_p8 = scmp.ne.s32.totalorder %s301_s20, %s402_s21  ;;  %p408_p10 = scmp.lt.s32.totalorder %s402_s21, %s402_s21 }
  0x21   :  { %v43_v51 = vmax.f32 %v468_v7, 0.0  ;;  %330 = vpow2.f32 %v101_v37  ;;  %v107_v52 = vmul.f32 1.442695, %v81_v44  ;;  %v44_v54 = vmax.f32 %v471_v11, 0.0 }
  0x22   :  { %v45_v55 = vmax.f32 %v474_v14, 0.0  ;;  %332 = vpow2.f32 %v103_v43  ;;  %v67_v56 = vand.u32 2147483647, %v494_v45  ;;  %v46_v60 = vmax.f32 %v476_v15, 0.0  ;;  %p409_p11 = por %p408_p10, %p407_p9 }
  0x23   :  { %334 = vpow2.f32 %v105_v48  ;;  %v109_v61 = vmul.f32 1.442695, %v82_v49  ;;  %v47_v10 = vmax.f32 %v481_v27, 0.0  ;;  %v68_v12 = vand.u32 2147483647, %v503_v57 }
  0x24   :  { %v317_v53 = vpop.eup %316  ;;  %336 = vpow2.f32 %v107_v52  ;;  %v510_v18 = vsub.f32 0.0, %v67_v56  ;;  %v69_v21 = vand.u32 2147483647, %v506_v5  ;;  %v49_v27 = vmax.f32 %v485_v31, 0.0  ;;  %p410_p12 = pnand %p409_p11, %p403_p8 }
  0x25   :  { %v319_v58 = vpop.eup %318  ;;  %v119_v59 = vadd.f32 1.0, %v317_v53  ;;  %v122_v63 = vmul.f32 -0.5, %v317_v53  ;;  %v125_v16 = vand.u32 2147483647, %v317_v53 }
  0x26   :  { %v321_v62 = vpop.eup %320  ;;  %v128_v3 = vadd.f32 1.0, %v319_v58  ;;  %v131_v4 = vmul.f32 -0.5, %v319_v58  ;;  %v134_v19 = vand.u32 2147483647, %v319_v58 }
  0x27   :  { %v323_v8 = vpop.eup %322  ;;  %338 = vlog2.f32 %v119_v59  ;;  %v137_v9 = vadd.f32 1.0, %v321_v62  ;;  %v140_v17 = vmul.f32 -0.5, %v321_v62  ;;  %v123_v23 = vadd.f32 1.0, %v122_v63 }
  0x28   :  { %v325_v13 = vpop.eup %324  ;;  %340 = vlog2.f32 %v128_v3  ;;  %v146_v20 = vadd.f32 1.0, %v323_v8  ;;  %v132_v24 = vadd.f32 1.0, %v131_v4  ;;  %v149_v25 = vmul.f32 -0.5, %v323_v8 }
  0x29   :  { %342 = vlog2.f32 %v137_v9  ;;  %v327_v22 = vpop.eup %326  ;;  %v143_v29 = vand.u32 2147483647, %v321_v62  ;;  %v155_v30 = vadd.f32 1.0, %v325_v13  ;;  %v158_v32 = vmul.f32 -0.5, %v325_v13 }
  0x2a   :  { %344 = vpow2.f32 %v109_v61  ;;  %v513_v26 = vpop.eup %328  ;;  %vm515_vm0 = vcmp.lt.f32.partialorder %v125_v16, 0.0004427343  ;;  %v141_v35 = vadd.f32 1.0, %v140_v17  ;;  %v150_v36 = vadd.f32 1.0, %v149_v25 }
  0x2b   :  { %346 = vlog2.f32 %v146_v20  ;;  %v152_v37 = vand.u32 2147483647, %v323_v8  ;;  %v519_v38 = vpop.eup %330  ;;  %v161_v39 = vand.u32 2147483647, %v325_v13  ;;  %v164_v40 = vadd.f32 1.0, %v327_v22 }
  0x2c   :  { %348 = vlog2.f32 %v155_v30  ;;  %v167_v41 = vmul.f32 -0.5, %v327_v22  ;;  %v521_v43 = vpop.eup %332  ;;  %v124_v44 = vmul.f32 %v317_v53, %v123_v23  ;;  %v133_v48 = vmul.f32 %v319_v58, %v132_v24 }
  0x2d   :  { %vm523_vm1 = vcmp.lt.f32.partialorder %v134_v19, 0.0004427343  ;;  %v173_v52 = vadd.f32 1.0, %v513_v26  ;;  %v528_v56 = vpop.eup %334  ;;  %vm530_vm2 = vcmp.lt.f32.partialorder %v143_v29, 0.0004427343  ;;  %v159_v61 = vadd.f32 1.0, %v158_v32 }
  0x2e   :  { %350 = vlog2.f32 %v164_v40  ;;  %v176_v63 = vmul.f32 -0.5, %v513_v26  ;;  %v535_v3 = vpop.eup %336  ;;  %v142_v53 = vmul.f32 %v321_v62, %v141_v35  ;;  %vm537_vm3 = vcmp.lt.f32.partialorder %v152_v37, 0.0004427343 }
  0x2f   :  { %352 = vlog2.f32 %v173_v52  ;;  %v182_v4 = vadd.f32 1.0, %v519_v38  ;;  %v151_v16 = vmul.f32 %v323_v8, %v150_v36  ;;  %vm542_vm4 = vcmp.lt.f32.partialorder %v161_v39, 0.0004427343 }
  0x30   :  { %v168_v19 = vadd.f32 1.0, %v167_v41  ;;  %v170_v20 = vand.u32 2147483647, %v327_v22  ;;  %v185_v62 = vmul.f32 -0.5, %v519_v38  ;;  %v191_v25 = vadd.f32 1.0, %v521_v43 }
  0x31   :  { %v339_v9 = vpop.eup %338  ;;  %354 = vlog2.f32 %v182_v4  ;;  %v160_v32 = vmul.f32 %v325_v13, %v159_v61  ;;  %v177_v35 = vadd.f32 1.0, %v176_v63  ;;  %v179_v37 = vand.u32 2147483647, %v513_v26 }
  0x32   :  { %v341_v23 = vpop.eup %340  ;;  %v121_v24 = vmul.f32 0.6931472, %v339_v9  ;;  %356 = vlog2.f32 %v191_v25  ;;  %v194_v40 = vmul.f32 -0.5, %v521_v43  ;;  %v169_v13 = vmul.f32 %v327_v22, %v168_v19 }
  0x33   :  { %v343_v29 = vpop.eup %342  ;;  %v130_v30 = vmul.f32 0.6931472, %v341_v23  ;;  %vm558_vm5 = vcmp.lt.f32.partialorder %v170_v20, 0.0004427343  ;;  %v186_v9 = vadd.f32 1.0, %v185_v62  ;;  %v178_v49 = vmul.f32 %v513_v26, %v177_v35 }
  0x34   :  { %v549_v8 = vpop.eup %344  ;;  %v127_v36 = vsel %vm515_vm0, %v124_v44, %v121_v24  ;;  %v139_v39 = vmul.f32 0.6931472, %v343_v29  ;;  %vm568_vm6 = vcmp.lt.f32.partialorder %v179_v37, 0.0004427343  ;;  %v188_v22 = vand.u32 2147483647, %v519_v38 }
  0x35   :  { %v347_v41 = vpop.eup %346  ;;  %v263_v52 = vadd.f32 %v127_v36, %v39_v42  ;;  %v136_v4 = vsel %vm523_vm1, %v133_v48, %v130_v30  ;;  %v200_v48 = vadd.f32 1.0, %v528_v56  ;;  %v195_v59 = vadd.f32 1.0, %v194_v40 }
  0x36   :  { %v264_v33 = vadd.f32 %v136_v4, %v40_v46  ;;  %v145_v44 = vsel %vm530_vm2, %v142_v53, %v139_v39  ;;  %v148_v63 = vmul.f32 0.6931472, %v347_v41  ;;  %v349_v23 = vpop.eup %348  ;;  %v209_v19 = vadd.f32 1.0, %v535_v3 }
  0x37   :  { %279 = vst [vmem:[#allocation5] sm:$0xff] %v263_v52  ;;  %v265_v0 = vadd.f32 %v145_v44, %v41_v47  ;;  %v157_v46 = vmul.f32 0.6931472, %v349_v23  ;;  %358 = vlog2.f32 %v200_v48  ;;  %v203_v47 = vmul.f32 -0.5, %v528_v56 }
  0x38   :  { %280 = vst [vmem:[#allocation5 + $0x8] sm:$0xff] %v264_v33  ;;  %v154_v1 = vsel %vm537_vm3, %v151_v16, %v148_v63  ;;  %v351_v53 = vpop.eup %350  ;;  %v187_v16 = vmul.f32 %v519_v38, %v186_v9  ;;  %v197_v26 = vand.u32 2147483647, %v521_v43  ;;  %360 = vlog2.f32 %v209_v19 }
  0x39   :  { %281 = vst [vmem:[#allocation5 + $0x10] sm:$0xff] %v265_v0  ;;  %v266_v2 = vadd.f32 %v154_v1, %v42_v50  ;;  %v353_v20 = vpop.eup %352  ;;  %v163_v24 = vsel %vm542_vm4, %v160_v32, %v157_v46  ;;  %v166_v58 = vmul.f32 0.6931472, %v351_v53  ;;  %v212_v50 = vmul.f32 -0.5, %v535_v3 }
  0x3a   :  { %v267_v62 = vadd.f32 %v163_v24, %v43_v51  ;;  %v175_v6 = vmul.f32 0.6931472, %v353_v20  ;;  %vm590_vm7 = vcmp.lt.f32.partialorder %v188_v22, 0.0004427343  ;;  %v196_v38 = vmul.f32 %v521_v43, %v195_v59 }
  0x3b   :  { %282 = vst [vmem:[#allocation5 + $0x18] sm:$0xff] %v266_v2  ;;  %v355_v25 = vpop.eup %354  ;;  %v172_v29 = vsel %vm558_vm5, %v169_v13, %v166_v58  ;;  %v218_v30 = vadd.f32 1.0, %v549_v8  ;;  %v204_v35 = vadd.f32 1.0, %v203_v47  ;;  %vm602_vm8 = vcmp.lt.f32.partialorder %v197_v26, 0.0004427343  ;;  %v617_v13 = vld [vmem:[#allocation2 + $0x78] sm:$0xff] }
  0x3c   :  { %283 = vst [vmem:[#allocation5 + $0x20] sm:$0xff] %v267_v62  ;;  %v268_v7 = vadd.f32 %v172_v29, %v44_v54  ;;  %v181_v51 = vsel %vm568_vm6, %v178_v49, %v175_v6  ;;  %v184_v32 = vmul.f32 0.6931472, %v355_v25  ;;  %v357_v37 = vpop.eup %356  ;;  %v206_v43 = vand.u32 2147483647, %v528_v56 }
  0x3d   :  { %v269_v36 = vadd.f32 %v181_v51, %v45_v55  ;;  %362 = vlog2.f32 %v218_v30  ;;  %v193_v54 = vmul.f32 0.6931472, %v357_v37  ;;  %v213_v40 = vadd.f32 1.0, %v212_v50 }
  0x3e   :  { %284 = vst [vmem:[#allocation5 + $0x28] sm:$0xff] %v268_v7  ;;  %v190_v11 = vsel %vm590_vm7, %v187_v16, %v184_v32  ;;  %v221_v41 = vmul.f32 -0.5, %v549_v8  ;;  %v111_v55 = vmul.f32 1.442695, %v510_v18  ;;  %v84_v52 = vsub.f32 0.0, %v68_v12 }
  0x3f   :  { %285 = vst [vmem:[#allocation5 + $0x30] sm:$0xff] %v269_v36  ;;  %v270_v14 = vadd.f32 %v190_v11, %v46_v60  ;;  %v85_v4 = vsub.f32 0.0, %v69_v21  ;;  %v199_v61 = vsel %vm602_vm8, %v196_v38, %v193_v54  ;;  %v205_v33 = vmul.f32 %v528_v56, %v204_v35 }
  0x40   :  { %v215_v44 = vand.u32 2147483647, %v535_v3  ;;  %v271_v15 = vadd.f32 %v199_v61, %v47_v10  ;;  %364 = vpow2.f32 %v111_v55  ;;  %v113_v60 = vmul.f32 1.442695, %v84_v52 }
  0x41   :  { %286 = vst [vmem:[#allocation5 + $0x38] sm:$0xff] %v270_v14  ;;  %v115_v18 = vmul.f32 1.442695, %v85_v4  ;;  %v359_v12 = vpop.eup %358  ;;  %v48_v63 = vmax.f32 %v483_v28, 0.0  ;;  %vm207_vm9 = vcmp.lt.f32.partialorder %v206_v43, 0.0004427343  ;;  %v214_v56 = vmul.f32 %v535_v3, %v213_v40 }
  0x42   :  { %v222_v21 = vadd.f32 1.0, %v221_v41  ;;  %v70_v9 = vand.u32 2147483647, %v617_v13  ;;  %287 = vst [vmem:[#allocation5 + $0x40] sm:$0xff] %v271_v15  ;;  %v202_v23 = vmul.f32 0.6931472, %v359_v12  ;;  %366 = vpow2.f32 %v113_v60  ;;  %v361_v42 = vpop.eup %360 }
  0x43   :  { %v224_v0 = vand.u32 2147483647, %v549_v8  ;;  %vm216_vm10 = vcmp.lt.f32.partialorder %v215_v44, 0.0004427343  ;;  %368 = vpow2.f32 %v115_v18  ;;  %v211_v48 = vmul.f32 0.6931472, %v361_v42 }
  0x44   :  { %v86_v10 = vsub.f32 0.0, %v70_v9  ;;  %v208_v22 = vsel %vm207_vm9, %v205_v33, %v202_v23  ;;  %v223_v1 = vmul.f32 %v549_v8, %v222_v21  ;;  %v50_v53 = vmax.f32 %v488_v34, 0.0 }
  0x45   :  { %v272_v28 = vadd.f32 %v208_v22, %v48_v63  ;;  %v217_v59 = vsel %vm216_vm10, %v214_v56, %v211_v48  ;;  %vm225_vm11 = vcmp.lt.f32.partialorder %v224_v0, 0.0004427343  ;;  %v51_v37 = vmax.f32 %v494_v45, 0.0 }
  0x46   :  { %v117_v46 = vmul.f32 1.442695, %v86_v10  ;;  %v273_v3 = vadd.f32 %v217_v59, %v49_v27  ;;  %v52_v39 = vmax.f32 %v503_v57, 0.0  ;;  %v53_v54 = vmax.f32 %v506_v5, 0.0 }
  0x47   :  { %v363_v49 = vpop.eup %362  ;;  %288 = vst [vmem:[#allocation5 + $0x48] sm:$0xff] %v272_v28  ;;  %v54_v12 = vmax.f32 %v617_v13, 0.0 }
  0x48   :  { %v220_v2 = vmul.f32 0.6931472, %v363_v49  ;;  %370 = vpow2.f32 %v117_v46  ;;  %289 = vst [vmem:[#allocation5 + $0x50] sm:$0xff] %v273_v3 }
  0x4a   :  { %v226_v31 = vsel %vm225_vm11, %v223_v1, %v220_v2  ;;  %v365_v47 = vpop.eup %364 }
  0x4b   :  { %v274_v19 = vadd.f32 %v226_v31, %v50_v53  ;;  %v227_v20 = vadd.f32 1.0, %v365_v47  ;;  %v230_v16 = vmul.f32 -0.5, %v365_v47  ;;  %v233_v29 = vand.u32 2147483647, %v365_v47 }
  0x4c   :  { %v367_v24 = vpop.eup %366 }
  0x4d   :  { %290 = vst [vmem:[#allocation5 + $0x58] sm:$0xff] %v274_v19  ;;  %v369_v58 = vpop.eup %368  ;;  %372 = vlog2.f32 %v227_v20  ;;  %v236_v8 = vadd.f32 1.0, %v367_v24  ;;  %v239_v62 = vmul.f32 -0.5, %v367_v24  ;;  %v231_v50 = vadd.f32 1.0, %v230_v16 }
  0x4e   :  { %v245_v26 = vadd.f32 1.0, %v369_v58  ;;  %v248_v6 = vmul.f32 -0.5, %v369_v58  ;;  %v242_v38 = vand.u32 2147483647, %v367_v24  ;;  %v251_v32 = vand.u32 2147483647, %v369_v58 }
  0x4f   :  { %374 = vlog2.f32 %v236_v8  ;;  %v240_v17 = vadd.f32 1.0, %v239_v62  ;;  %v232_v51 = vmul.f32 %v365_v47, %v231_v50  ;;  %vm234_vm12 = vcmp.lt.f32.partialorder %v233_v29, 0.0004427343 }
  0x50   :  { %376 = vlog2.f32 %v245_v26  ;;  %v249_v30 = vadd.f32 1.0, %v248_v6  ;;  %vm243_vm13 = vcmp.lt.f32.partialorder %v242_v38, 0.0004427343  ;;  %vm252_vm14 = vcmp.lt.f32.partialorder %v251_v32, 0.0004427343 }
  0x51   :  { %v241_v43 = vmul.f32 %v367_v24, %v240_v17 }
  0x52   :  { %v371_v34 = vpop.eup %370  ;;  %v250_v40 = vmul.f32 %v369_v58, %v249_v30 }
  0x53   :  { %v254_v25 = vadd.f32 1.0, %v371_v34  ;;  %v257_v7 = vmul.f32 -0.5, %v371_v34  ;;  %v260_v4 = vand.u32 2147483647, %v371_v34 }
  0x55   :  { %378 = vlog2.f32 %v254_v25  ;;  %v258_v41 = vadd.f32 1.0, %v257_v7  ;;  %vm261_vm15 = vcmp.lt.f32.partialorder %v260_v4, 0.0004427343 }
  0x57   :  { %v373_v35 = vpop.eup %372  ;;  %v259_v60 = vmul.f32 %v371_v34, %v258_v41 }
  0x58   :  { %v229_v36 = vmul.f32 0.6931472, %v373_v35 }
  0x59   :  { %v375_v11 = vpop.eup %374 }
  0x5a   :  { %v377_v14 = vpop.eup %376  ;;  %v235_v55 = vsel %vm234_vm12, %v232_v51, %v229_v36  ;;  %v238_v52 = vmul.f32 0.6931472, %v375_v11 }
  0x5b   :  { %v275_v61 = vadd.f32 %v235_v55, %v51_v37  ;;  %v247_v33 = vmul.f32 0.6931472, %v377_v14 }
  0x5c   :  { %v244_v44 = vsel %vm243_vm13, %v241_v43, %v238_v52 }
  0x5d   :  { %291 = vst [vmem:[#allocation5 + $0x60] sm:$0xff] %v275_v61  ;;  %v276_v45 = vadd.f32 %v244_v44, %v52_v39  ;;  %v253_v15 = vsel %vm252_vm14, %v250_v40, %v247_v33 }
  0x5e   :  { %v277_v18 = vadd.f32 %v253_v15, %v53_v54 }
  0x5f   :  { %v379_v57 = vpop.eup %378  ;;  %292 = vst [vmem:[#allocation5 + $0x68] sm:$0xff] %v276_v45 }
  0x60   :  { %v256_v5 = vmul.f32 0.6931472, %v379_v57  ;;  %293 = vst [vmem:[#allocation5 + $0x70] sm:$0xff] %v277_v18 }
  0x62   :  { %v262_v63 = vsel %vm261_vm15, %v259_v60, %v256_v5 }
  0x63   :  { %v278_v21 = vadd.f32 %v262_v63, %v54_v12 }
  0x65   :  { %294 = vst [vmem:[#allocation5 + $0x78] sm:$0xff] %v278_v21 }
  0x66   :  { %413 = shalt.err (!%p410_p12)
}
  0x67   :  { %s414_s24 = scalar_lea.hbm %s652_s1, 2048 }
  0x68   :  { %p415_p13 = scmp.ne.s32.totalorder %s652_s1, %s414_s24  ;;  %p418_p0 = scmp.lt.u32.totalorder %s414_s24, %s652_s1 }
  0x6a   :  { %p420_p1 = pnand %p418_p0, %p415_p13 }
  0x6c   :  { %423 = shalt.err (!%p420_p1)
}
  0x6d   :  { %306 = dma.vmem_to_hbm [thread:$0]  %s301_s20, 2048, %s652_s1, [#allocation4], %s429_s16, %s429_s16, %s430_s17  }
  0x6e   :  { %426 = dma.done.wait [#allocation4], 2048  }
  0x6f   :  { %427 = vsyncadd [#allocation4], 4294965248 }
  0x70   :  { %310 = vsyncpa [#allocation3], 1 }
  0x71   :  { %311 = vsyncpa [#allocation4], 1 }

</bundles_post_ra>
